<compile_context>
chip_gen: v6e
topology: v6e:2x2x1
jax: 0.10.0
libtpu: 0.0.40
codegen_flags: <defaults>
</compile_context>

<pallas_src>
import functools
import math

import jax
import jax.numpy as jnp
from jax.experimental import pallas as pl
from jax.experimental.pallas import tpu as pltpu

_INV_SQRT2 = 1.0 / math.sqrt(2.0)


def _round_up(n, m):
    return ((n + m - 1) // m) * m


def _vmem_capacity_bytes():
    try:
        return int(pltpu.get_tpu_info().vmem_capacity_bytes)
    except Exception:
        return 64 * 1024 * 1024  # conservative (v7x per-TC)


def _gelu_erf(h):
    # exact-erf GELU == torch.nn.GELU() default
    return 0.5 * h * (1.0 + jax.lax.erf(h * _INV_SQRT2))


def _ffn_step(x_tile, w1_tile, b1_tile, w2_tile, acc_ref, j):
    """gelu(x @ W1_j + b1_j) @ W2_j accumulated into acc_ref (f32)."""
    @pl.when(j == 0)
    def _init():
        acc_ref[...] = jnp.zeros(acc_ref.shape, acc_ref.dtype)

    h = jnp.dot(x_tile, w1_tile, preferred_element_type=jnp.float32)
    h = h + b1_tile                      # (1, th) f32 bias, broadcast
    h = _gelu_erf(h)                     # f32
    acc_ref[...] += jnp.dot(h.astype(w2_tile.dtype), w2_tile,
                            preferred_element_type=jnp.float32)


def _finalize(acc_ref, b2_ref, o_ref, j):
    @pl.when(j == pl.num_programs(1) - 1)
    def _fin():
        o_ref[...] = (acc_ref[...] + b2_ref[...]).astype(o_ref.dtype)


def _ffn_kernel_resident(x_ref, w1_ref, b1_ref, w2_ref, b2_ref, o_ref,
                         *scratch, th):
    """W1/W2 fully resident in VMEM; slice the hidden tile in-kernel."""
    j = pl.program_id(1)
    acc_ref = scratch[0] if scratch else o_ref   # f32 output -> accumulate in o_ref
    off = pl.multiple_of(j * th, 128)
    w1_t = w1_ref[:, pl.ds(off, th)]
    b1_t = b1_ref[:, pl.ds(off, th)]
    w2_t = w2_ref[pl.ds(off, th), :]
    _ffn_step(x_ref[...], w1_t, b1_t, w2_t, acc_ref, j)
    _finalize(acc_ref, b2_ref, o_ref, j)


def _ffn_kernel_streamed(x_ref, w1_ref, b1_ref, w2_ref, b2_ref, o_ref, *scratch):
    """Fallback: W1/W2 hidden-tiles streamed per grid step."""
    j = pl.program_id(1)
    acc_ref = scratch[0] if scratch else o_ref
    _ffn_step(x_ref[...], w1_ref[...], b1_ref[...], w2_ref[...], acc_ref, j)
    _finalize(acc_ref, b2_ref, o_ref, j)


def prepare_ffn_params(w1, b1, w2, b2, *, th=None, compute_dtype=jnp.bfloat16):
    """Pad + cast the weights ONCE (hoist out of the per-call path).

    w1: (d_model, hidden); b1: (hidden,); w2: (hidden, d_model); b2: (d_model,)
    """
    d_model, hidden = w1.shape
    if th is None:
        th = min(1024, _round_up(hidden, 256))   # multiple of 256 for v6e/v7x MXU
    else:
        th = _round_up(int(th), 128)
    d_pad = _round_up(d_model, 128)              # lane-dense output stores
    h_pad = _round_up(hidden, th)

    # Zero padding is exact: gelu(0 + 0) = 0 and zero rows of W2 add nothing;
    # padded output columns are sliced off.
    w1p = jnp.pad(w1, ((0, d_pad - d_model), (0, h_pad - hidden))).astype(compute_dtype)
    b1p = jnp.pad(b1, (0, h_pad - hidden)).astype(jnp.float32).reshape(1, h_pad)
    w2p = jnp.pad(w2, ((0, h_pad - hidden), (0, d_pad - d_model))).astype(compute_dtype)
    b2p = jnp.pad(b2, (0, d_pad - d_model)).astype(jnp.float32).reshape(1, d_pad)

    meta = dict(d_model=int(d_model), hidden=int(hidden), d_pad=int(d_pad),
                h_pad=int(h_pad), th=int(th), compute_dtype=compute_dtype)
    return (w1p, b1p, w2p, b2p), meta


def feed_forward_prepared(x, prepared, *, tm=None, force_streamed=False):
    """y = gelu(x @ W1 + b1) @ W2 + b2 with pre-padded/cast params."""
    (w1p, b1p, w2p, b2p), meta = prepared
    d_model = meta["d_model"]
    d_pad, h_pad, th = meta["d_pad"], meta["h_pad"], meta["th"]
    compute_dtype = meta["compute_dtype"]

    orig_shape = x.shape
    out_dtype = x.dtype
    x2 = x.reshape(-1, orig_shape[-1])
    m = x2.shape[0]

    cbytes = jnp.dtype(compute_dtype).itemsize
    obytes = jnp.dtype(out_dtype).itemsize
    use_scratch = jnp.dtype(out_dtype) != jnp.dtype(jnp.float32)

    # --- VMEM budget (per generation) --------------------------------------
    vmem_cap = _vmem_capacity_bytes()
    vmem_limit = max(32 << 20, vmem_cap - (8 << 20))   # ~56 MiB v7x, ~120 MiB v5e/v6e
    budget = int(vmem_limit * 0.9)

    w_bytes = (w1p.size + w2p.size) * cbytes
    # Resident weights only if, even conservatively double-counted, they leave
    # at least half the budget for the pipelined x/out tiles.
    resident = (not force_streamed) and (2 * w_bytes <= budget // 2)

    # --- Row-tile selection (multiple of 16 for bf16 sublane packing) -------
    if tm is None:
        per_row = d_pad * (2 * cbytes + 2 * obytes + (4 if use_scratch else 0)) + 4 * th
        if resident:
            avail = budget - 2 * w_bytes
        else:
            avail = budget - 4 * d_pad * th * cbytes   # double-buffered W1+W2 tiles
        tm = (avail // max(per_row, 1)) // 16 * 16
        tm = max(16, min(512, int(tm)))
    else:
        tm = max(16, _round_up(int(tm), 16))
    tm = min(tm, _round_up(m, 16))

    m_pad = _round_up(m, tm)
    xp = jnp.pad(x2, ((0, m_pad - m), (0, d_pad - d_model))).astype(compute_dtype)

    grid = (m_pad // tm, h_pad // th)

    if resident:
        kernel = functools.partial(_ffn_kernel_resident, th=th)
        in_specs = [
            pl.BlockSpec((tm, d_pad), lambda i, j: (i, 0)),    # x row-tile
            pl.BlockSpec((d_pad, h_pad), lambda i, j: (0, 0)),  # W1 resident
            pl.BlockSpec((1, h_pad), lambda i, j: (0, 0)),      # b1 resident
            pl.BlockSpec((h_pad, d_pad), lambda i, j: (0, 0)),  # W2 resident
            pl.BlockSpec((1, d_pad), lambda i, j: (0, 0)),      # b2
        ]
    else:
        kernel = _ffn_kernel_streamed
        in_specs = [
            pl.BlockSpec((tm, d_pad), lambda i, j: (i, 0)),    # x row-tile
            pl.BlockSpec((d_pad, th), lambda i, j: (0, j)),     # W1 col-tile
            pl.BlockSpec((1, th), lambda i, j: (0, j)),         # b1 tile
            pl.BlockSpec((th, d_pad), lambda i, j: (j, 0)),     # W2 row-tile
            pl.BlockSpec((1, d_pad), lambda i, j: (0, 0)),      # b2
        ]

    scratch_shapes = ([pltpu.VMEM((tm, d_pad), jnp.float32)]
                      if use_scratch else [])

    flops = 4 * m_pad * h_pad * d_pad
    bytes_accessed = (xp.size * cbytes + (w1p.size + w2p.size) * cbytes
                      + (b1p.size + b2p.size) * 4 + m_pad * d_pad * obytes)
    cost = pl.CostEstimate(flops=flops,
                           transcendentals=m_pad * h_pad,
                           bytes_accessed=int(bytes_accessed))

    y = pl.pallas_call(
        kernel,
        out_shape=jax.ShapeDtypeStruct((m_pad, d_pad), out_dtype),
        grid=grid,
        in_specs=in_specs,
        out_specs=pl.BlockSpec((tm, d_pad), lambda i, j: (i, 0)),
        scratch_shapes=scratch_shapes,
        compiler_params=pltpu.CompilerParams(
            dimension_semantics=("parallel", "arbitrary"),
            vmem_limit_bytes=int(vmem_limit)),
        cost_estimate=cost,
    )(xp, w1p, b1p, w2p, b2p)

    y = y[:m, :d_model]
    return y.reshape(orig_shape[:-1] + (d_model,))


def feed_forward(x, w1, b1, w2, b2, *, tm=None, th=None,
                 compute_dtype=jnp.bfloat16, force_streamed=False):
    """Convenience one-shot wrapper (prefer prepare_ffn_params once at init)."""
    prepared = prepare_ffn_params(w1, b1, w2, b2, th=th, compute_dtype=compute_dtype)
    return feed_forward_prepared(x, prepared, tm=tm, force_streamed=force_streamed)


def _reference(x, w1, b1, w2, b2):
    """Plain-JAX f32 reference (exact-erf GELU, like torch.nn.GELU())."""
    h = x @ w1 + b1
    h = _gelu_erf(h)
    return h @ w2 + b2


if __name__ == "__main__":
    # Small shapes, big enough to exercise real tiling: grid = (4, 2).
    B, L, d_model, hidden = 4, 64, 128, 512

    key = jax.random.PRNGKey(0)
    kx, k1, k2, k3, k4 = jax.random.split(key, 5)

    x = jax.random.normal(kx, (B, L, d_model), jnp.float32)
    bound1 = 1.0 / math.sqrt(d_model)
    w1 = jax.random.uniform(k1, (d_model, hidden), jnp.float32, -bound1, bound1)
    b1 = jax.random.uniform(k2, (hidden,), jnp.float32, -bound1, bound1)
    bound2 = 1.0 / math.sqrt(hidden)
    w2 = jax.random.uniform(k3, (hidden, d_model), jnp.float32, -bound2, bound2)
    b2 = jax.random.uniform(k4, (d_model,), jnp.float32, -bound2, bound2)

    ref = _reference(x, w1, b1, w2, b2)

    # Weights padded/cast ONCE (hoisted out of the per-call path).
    prepared = prepare_ffn_params(w1, b1, w2, b2, th=256)

    # 1) f32 output, resident-weights kernel (accumulates directly into o_ref).
    y = jax.block_until_ready(feed_forward_prepared(x, prepared, tm=64))
    assert y.shape == (B, L, d_model)
    assert bool(jnp.all(jnp.isfinite(y)))
    err = float(jnp.max(jnp.abs(y - ref)))
    assert err < 5e-2, f"resident f32 path: max abs error {err}"

    # 2) bf16 output path (uses the f32 VMEM accumulator scratch).
    y_bf = jax.block_until_ready(
        feed_forward_prepared(x.astype(jnp.bfloat16), prepared, tm=64))
    err_bf = float(jnp.max(jnp.abs(y_bf.astype(jnp.float32) - ref)))
    assert err_bf < 2e-1, f"bf16 path: max abs error {err_bf}"

    # 3) Streamed-weights fallback (used when W1+W2 don't fit in VMEM).
    y_s = jax.block_until_ready(
        feed_forward(x, w1, b1, w2, b2, tm=64, th=256, force_streamed=True))
    err_s = float(jnp.max(jnp.abs(y_s - ref)))
    assert err_s < 5e-2, f"streamed path: max abs error {err_s}"

    print("KERNEL_OK")
</pallas_src>

<mosaic_0001>
module attributes {stable_mosaic.version = 11 : i64} {
  func.func @_ffn_kernel_resident(%arg0: i32, %arg1: i32, %arg2: memref<64x128xbf16, #tpu.memory_space<vmem>>, %arg3: memref<128x512xbf16, #tpu.memory_space<vmem>>, %arg4: memref<1x512xf32, #tpu.memory_space<vmem>>, %arg5: memref<512x128xbf16, #tpu.memory_space<vmem>>, %arg6: memref<1x128xf32, #tpu.memory_space<vmem>>, %arg7: memref<64x128xf32, #tpu.memory_space<vmem>>) attributes {dimension_semantics = [#tpu.dimension_semantics<parallel>, #tpu.dimension_semantics<arbitrary>], iteration_bounds = array<i64: 4, 2>, scalar_prefetch = 0 : i64, scratch_operands = 0 : i64, tpu.core_type = #tpu.core_type<tc>, window_params = [{transform_indices = @transform_0, window_bounds = array<i64: 64, 128>}, {pipeline_mode = #tpu.pipeline_mode<synchronous>, transform_indices = @transform_1, window_bounds = array<i64: 128, 512>}, {pipeline_mode = #tpu.pipeline_mode<synchronous>, transform_indices = @transform_2, window_bounds = array<i64: 1, 512>}, {pipeline_mode = #tpu.pipeline_mode<synchronous>, transform_indices = @transform_3, window_bounds = array<i64: 512, 128>}, {pipeline_mode = #tpu.pipeline_mode<synchronous>, transform_indices = @transform_4, window_bounds = array<i64: 1, 128>}, {transform_indices = @transform_5, window_bounds = array<i64: 64, 128>}]} {
    %c256_i32 = arith.constant 256 : i32
    %0 = arith.muli %arg1, %c256_i32 : i32
    %1 = tpu.assume_multiple %0, 128 : i32
    %c0 = arith.constant 0 : index
    %2 = arith.index_cast %1 : i32 to index
    %3 = vector.load %arg3[%c0, %2] : memref<128x512xbf16, #tpu.memory_space<vmem>>, vector<128x256xbf16>
    %c0_0 = arith.constant 0 : index
    %4 = arith.index_cast %1 : i32 to index
    %5 = vector.load %arg4[%c0_0, %4] : memref<1x512xf32, #tpu.memory_space<vmem>>, vector<1x256xf32>
    %6 = arith.index_cast %1 : i32 to index
    %c0_1 = arith.constant 0 : index
    %7 = vector.load %arg5[%6, %c0_1] : memref<512x128xbf16, #tpu.memory_space<vmem>>, vector<256x128xbf16>
    %c0_2 = arith.constant 0 : index
    %c0_3 = arith.constant 0 : index
    %8 = vector.load %arg2[%c0_2, %c0_3] : memref<64x128xbf16, #tpu.memory_space<vmem>>, vector<64x128xbf16>
    %c0_i32 = arith.constant 0 : i32
    %9 = arith.cmpi eq, %arg1, %c0_i32 : i32
    %10 = arith.extui %9 : i1 to i32
    %c0_i32_4 = arith.constant 0 : i32
    %11 = arith.cmpi ne, %10, %c0_i32_4 : i32
    scf.if %11 {
      %cst_14 = arith.constant 0.000000e+00 : f32
      %31 = vector.broadcast %cst_14 : f32 to vector<64x128xf32>
      %c0_15 = arith.constant 0 : index
      %c0_16 = arith.constant 0 : index
      %32 = vector.load %arg7[%c0_15, %c0_16] : memref<64x128xf32, #tpu.memory_space<vmem>>, vector<64x128xf32>
      tpu.vector_store %arg7[%c0_15, %c0_16], %31 {strides = array<i32>} : memref<64x128xf32, #tpu.memory_space<vmem>>, vector<64x128xf32>,
    } else {
    }
    %cst = arith.constant dense<0.000000e+00> : vector<64x256xf32>
    %12 = tpu.matmul %8, %3, %cst {dimension_numbers = #tpu.dot_dimension_numbers<[1], [0], [0], [1], [0, 0, 1, 1], [], []>} : vector<64x128xbf16>, vector<128x256xbf16>, vector<64x256xf32> -> vector<64x256xf32>
    %13 = vector.broadcast %5 : vector<1x256xf32> to vector<64x256xf32>
    %14 = arith.addf %12, %13 : vector<64x256xf32>
    %cst_5 = arith.constant 5.000000e-01 : f32
    %15 = vector.broadcast %cst_5 : f32 to vector<64x256xf32>
    %16 = arith.mulf %15, %14 : vector<64x256xf32>
    %cst_6 = arith.constant 0.707106769 : f32
    %17 = vector.broadcast %cst_6 : f32 to vector<64x256xf32>
    %18 = arith.mulf %14, %17 : vector<64x256xf32>
    %19 = math.erf %18 : vector<64x256xf32>
    %cst_7 = arith.constant 1.000000e+00 : f32
    %20 = vector.broadcast %cst_7 : f32 to vector<64x256xf32>
    %21 = arith.addf %20, %19 : vector<64x256xf32>
    %22 = arith.mulf %16, %21 : vector<64x256xf32>
    %c0_8 = arith.constant 0 : index
    %c0_9 = arith.constant 0 : index
    %23 = vector.load %arg7[%c0_8, %c0_9] : memref<64x128xf32, #tpu.memory_space<vmem>>, vector<64x128xf32>
    %24 = arith.truncf %22 : vector<64x256xf32> to vector<64x256xbf16>
    %cst_10 = arith.constant dense<0.000000e+00> : vector<64x128xf32>
    %25 = tpu.matmul %24, %7, %cst_10 {dimension_numbers = #tpu.dot_dimension_numbers<[1], [0], [0], [1], [0, 0, 1, 1], [], []>} : vector<64x256xbf16>, vector<256x128xbf16>, vector<64x128xf32> -> vector<64x128xf32>
    %26 = arith.addf %23, %25 : vector<64x128xf32>
    %c0_11 = arith.constant 0 : index
    %c0_12 = arith.constant 0 : index
    %27 = vector.load %arg7[%c0_11, %c0_12] : memref<64x128xf32, #tpu.memory_space<vmem>>, vector<64x128xf32>
    tpu.vector_store %arg7[%c0_11, %c0_12], %26 {strides = array<i32>} : memref<64x128xf32, #tpu.memory_space<vmem>>, vector<64x128xf32>,
    %c1_i32 = arith.constant 1 : i32
    %28 = arith.cmpi eq, %arg1, %c1_i32 : i32
    %29 = arith.extui %28 : i1 to i32
    %c0_i32_13 = arith.constant 0 : i32
    %30 = arith.cmpi ne, %29, %c0_i32_13 : i32
    scf.if %30 {
      %c0_14 = arith.constant 0 : index
      %c0_15 = arith.constant 0 : index
      %31 = vector.load %arg7[%c0_14, %c0_15] : memref<64x128xf32, #tpu.memory_space<vmem>>, vector<64x128xf32>
      %c0_16 = arith.constant 0 : index
      %c0_17 = arith.constant 0 : index
      %32 = vector.load %arg6[%c0_16, %c0_17] : memref<1x128xf32, #tpu.memory_space<vmem>>, vector<1x128xf32>
      %33 = vector.broadcast %32 : vector<1x128xf32> to vector<64x128xf32>
      %34 = arith.addf %31, %33 : vector<64x128xf32>
      %c0_18 = arith.constant 0 : index
      %c0_19 = arith.constant 0 : index
      %35 = vector.load %arg7[%c0_18, %c0_19] : memref<64x128xf32, #tpu.memory_space<vmem>>, vector<64x128xf32>
      tpu.vector_store %arg7[%c0_18, %c0_19], %34 {strides = array<i32>} : memref<64x128xf32, #tpu.memory_space<vmem>>, vector<64x128xf32>,
    } else {
    }
    return
  }
  func.func @transform_0(%arg0: i32, %arg1: i32) -> (i32, i32) {
    %c0_i32 = arith.constant 0 : i32
    %c0_i32_0 = arith.constant 0 : i32
    return %arg0, %c0_i32 : i32, i32
  }
  func.func @transform_1(%arg0: i32, %arg1: i32) -> (i32, i32) {
    %c0_i32 = arith.constant 0 : i32
    %c0_i32_0 = arith.constant 0 : i32
    %c0_i32_1 = arith.constant 0 : i32
    return %c0_i32, %c0_i32_0 : i32, i32
  }
  func.func @transform_2(%arg0: i32, %arg1: i32) -> (i32, i32) {
    %c0_i32 = arith.constant 0 : i32
    %c0_i32_0 = arith.constant 0 : i32
    %c0_i32_1 = arith.constant 0 : i32
    return %c0_i32, %c0_i32_0 : i32, i32
  }
  func.func @transform_3(%arg0: i32, %arg1: i32) -> (i32, i32) {
    %c0_i32 = arith.constant 0 : i32
    %c0_i32_0 = arith.constant 0 : i32
    %c0_i32_1 = arith.constant 0 : i32
    return %c0_i32, %c0_i32_0 : i32, i32
  }
  func.func @transform_4(%arg0: i32, %arg1: i32) -> (i32, i32) {
    %c0_i32 = arith.constant 0 : i32
    %c0_i32_0 = arith.constant 0 : i32
    %c0_i32_1 = arith.constant 0 : i32
    return %c0_i32, %c0_i32_0 : i32, i32
  }
  func.func @transform_5(%arg0: i32, %arg1: i32) -> (i32, i32) {
    %c0_i32 = arith.constant 0 : i32
    %c0_i32_0 = arith.constant 0 : i32
    return %arg0, %c0_i32 : i32, i32
  }
}

</mosaic_0001>

<bundles_post_ra>
// kernel: tpu_custom_call.1
= control target key start
LH: loop header
LB: loop body
LE: loop exit
PB: predicated region body
PF: predicated region fallthrough
CT: control target
= control target key end

     0   :  { %s2044_s0 = inlined_call_operand.hbm [shape: bf16[256,128], index: 0, kind: input, shape index: {}]   ;;  %s2045_s1 = inlined_call_operand.hbm [shape: bf16[128,512], index: 1, kind: input, shape index: {}]   ;;  %s2046_s2 = inlined_call_operand.hbm [shape: f32[1,512], index: 2, kind: input, shape index: {}]   ;;  %s2047_s3 = inlined_call_operand.hbm [shape: bf16[512,128], index: 3, kind: input, shape index: {}]   ;;  %s2048_s4 = inlined_call_operand.vmem [shape: f32[1,128], index: 4, kind: input, shape index: {}]   ;;  %s2049_s5 = inlined_call_operand.hbm [shape: f32[256,128], index: 5, kind: output, shape index: {}]  }
   0x1   :  { %2056 = sst [smem:[#allocation15_spill]] %s2045_s1 }
   0x2   :  { %2057 = sst [smem:[#allocation16_spill]] %s2046_s2 }
   0x3   :  { %2058 = sst [smem:[#allocation17_spill]] %s2047_s3 }
   0x4   :  { %10 = vsyncpa [#allocation3], 0 }
   0x5   :  { %12 = vsyncpa [#allocation3 + $0x1], 0 }
   0x6   :  { %13 = vsyncpa [#allocation6], 0 }
   0x7   :  { %14 = vsyncpa [#allocation9], 0 }
   0x8   :  { %15 = vsyncpa [#allocation4], 0 }
   0x9   :  { %17 = vsyncpa [#allocation4 + $0x1], 0  ;;  %s1516_s18 = smov 0   ;;  %s1518_s19 = smov 0  }
   0xa   :  { %s1520_s20 = smov 0   ;;  %s1522_s21 = smov 0  }
   0xb   :  { %s1524_s22 = smov 0   ;;  %s1526_s23 = smov 0  }
   0xc   :  { %s1528_s24 = smov 0   ;;  %s1530_s25 = smov 0  }
   0xd LB: > { %s1007_s26 = sadd.s32 4294967295, %s1471_s25   ;;  %s1008_s27 = sadd.s32 4294967294, %s1471_s25   ;;  %s1471_s25 = sphi %s1530_s25, %s23_s25   ;;  %s1467_s24 = sphi %s1528_s24, %s2082_s24   ;;  %s1463_s23 = sphi %s1526_s23, %s2081_s23   ;;  %s1459_s22 = sphi %s1524_s22, %s2080_s22   ;;  %s1455_s21 = sphi %s1522_s21, %s2079_s21   ;;  %s1451_s20 = sphi %s1520_s20, %s2078_s20   ;;  %s1447_s19 = sphi %s1518_s19, %s2077_s19   ;;  %s1443_s18 = sphi %s1516_s18, %s2076_s18  }
   0xe   : > { %p55_p0 = scmp.ne.s32.totalorder %s1447_s19, %s1443_s18  ;;  %p1560_p1 = scmp.eq.s32.totalorder %s1007_s26, 0 }
   0xf   : > { %p1564_p2 = scmp.eq.s32.totalorder %s1007_s26, 7  ;;  %p169_p3 = scmp.eq.s32.totalorder %s1008_s27, 7 }
  0x10   : > { %s2059_s28 = scalar_select %p1560_p1, 1, 0 }
  0x11   : > { %p1570_p4 = por %p1560_p1, %p55_p0  ;;  %p1009_p5 = scmp.ge.s32.totalorder %s1471_s25, 1 }
  0x12   : > { %p1575_p6 = por %p169_p3, %p55_p0  ;;  %p176_p7 = scmp.lt.s32.totalorder %s1471_s25, 9 }
  0x13   : > { %s2061_s30 = scalar_select %p1570_p4, 1, 0 }
  0x14   : > { %s2062_s6 = scalar_select %p1575_p6, 1, 0 }
  0x15   : > { %p1580_p8 = pnand %p1009_p5, %p176_p7  ;;  %s1473_s8 = smov [#allocation5]  }
  0x16   : > { %s188_s9 = sshll.u32 %s1473_s8, 4  ;;  %s1474_s11 = smov [#allocation7]   ;;  %s189_s9 = int_to_ptr.vmem [resolvable:$true] %s188_s9 }
  0x17   : > { %s2063_s7 = scalar_select %p1580_p8, 1, 0 }
  0x18   : > { %p1128_p9 = pneg %p1580_p8  ;;  %s202_s12 = sshll.u32 %s1474_s11, 4  ;;  %s203_s12 = int_to_ptr.vmem [resolvable:$true] %s202_s12 }
  0x19   : > { %s1475_s13 = smov [#allocation8]   ;;  %s1272_s15 = scalar_lea.vmem %s189_s9, 4096 }
  0x1a   : > { %p1588_p10 = pnand %p1128_p9, %p1560_p1  ;;  %s212_s14 = sshll.u32 %s1475_s13, 4  ;;  %s213_s14 = int_to_ptr.vmem [resolvable:$true] %s212_s14 }
  0x1b   : > { %p1273_p12 = scmp.ne.s32.totalorder %s189_s9, %s1272_s15  ;;  %p1280_p3 = scmp.lt.s32.totalorder %s189_s9, %s189_s9 }
  0x1c   : > { %p1263_p11 = pneg %p1588_p10  ;;  %p1281_p5 = scmp.lt.s32.totalorder %s1272_s15, %s1272_s15 }
  0x1e   : > { %p1275_p13 = pnand %p1273_p12, %p1263_p11  ;;  %p1282_p7 = por %p1281_p5, %p1280_p3 }
  0x20   : > { %p1276_p0 = pneg %p1275_p13 }
  0x22   : > { %p1283_p9 = pnand %p1282_p7, %p1276_p0 }
  0x24   : > { %1286 = shalt.err (!%p1283_p9)
}
  0x25   : > { %s1476_s16 = smov 256   ;;  %s1477_s17 = smov 16  }
  0x26   : > { %s2065_s1 = sld [smem:[#allocation15_spill]]  ;;  %s1298_s8 = scalar_lea.vmem %s203_s12, 64 }
  0x27   : > { %p1299_p6 = scmp.ne.s32.totalorder %s203_s12, %s1298_s8  ;;  %p1306_p1 = scmp.lt.s32.totalorder %s203_s12, %s203_s12 }
  0x28   : > { %p1307_p4 = scmp.lt.s32.totalorder %s1298_s8, %s1298_s8 }
  0x29   : > { %p1301_p12 = pnand %p1299_p6, %p1263_p11 }
  0x2a   : > { %p1308_p3 = por %p1307_p4, %p1306_p1 }
  0x2b   : > { %p1302_p13 = pneg %p1301_p12 }
  0x2c   : > { %1131 = dma.hbm_to_vmem [thread:$0]  (!%p1588_p10), %s2065_s1, 4096, %s189_s9, [#allocation6], %s1476_s16, %s1476_s16, %s1477_s17  }
  0x2d   : > { %p1309_p0 = pnand %p1308_p3, %p1302_p13 }
  0x2f   : > { %1312 = shalt.err (!%p1309_p0)
}
  0x30   : > { %s2066_s2 = sld [smem:[#allocation16_spill]]  ;;  %s1324_s9 = scalar_lea.vmem %s213_s14, 4096 }
  0x31   : > { %p1325_p5 = scmp.ne.s32.totalorder %s213_s14, %s1324_s9  ;;  %p1332_p9 = scmp.lt.s32.totalorder %s213_s14, %s213_s14 }
  0x32   : > { %p1333_p12 = scmp.lt.s32.totalorder %s1324_s9, %s1324_s9 }
  0x33   : > { %p1327_p7 = pnand %p1325_p5, %p1263_p11 }
  0x34   : > { %p1334_p8 = por %p1333_p12, %p1332_p9 }
  0x35   : > { %p1328_p6 = pneg %p1327_p7 }
  0x36   : > { %1134 = dma.hbm_to_vmem [thread:$0]  (!%p1588_p10), %s2066_s2, 64, %s203_s12, [#allocation6]  }
  0x37   : > { %p1335_p1 = pnand %p1334_p8, %p1328_p6 }
  0x39   : > { %1338 = shalt.err (!%p1335_p1)
}
  0x3a   : > { %s2054_s15 = smov 64   ;;  %s2055_s12 = smov 4  }
  0x3b   : > { %s2067_s3 = sld [smem:[#allocation17_spill]]  ;;  %s32_s26 = sadd.s32 1, %s1463_s23 }
  0x3c   : > { %p33_p4 = scmp.ge.s32.totalorder %s32_s26, 2  ;;  %s35_s27 = sadd.s32 1, %s1467_s24 }
  0x3d   : > { %s42_s8 = sadd.s32 1, %s1451_s20  ;;  %p49_p8 = scmp.ne.s32.totalorder %s1451_s20, %s1447_s19 }
  0x3e   : > { %s2084_s26 = smov (%p33_p4, %s32_s26), 0  ;;  %s2086_s27 = smov (!%p33_p4, %s35_s27), %s1467_s24 }
  0x3f   : > { %p50_p11 = scmp.eq.s32.totalorder %s1471_s25, 0  ;;  %p1632_p13 = por %p1564_p2, %p49_p8 }
  0x40   : > { %p37_p3 = scmp.ge.s32.totalorder %s2086_s27, 4  ;;  %s1070_s9 = sshll.u32 %s1467_s24, 9 }
  0x41   : > { %1137 = dma.hbm_to_vmem [thread:$0]  (!%p1588_p10), %s2067_s3, 4096, %s213_s14, [#allocation9], %s2054_s15, %s2054_s15, %s2055_s12  }
  0x42   : > { %p1149_p10 = scmp.lt.s32.totalorder %s1471_s25, 8  ;;  %p51_p0 = por %p50_p11, %p49_p8 }
  0x43   : > { %s229_s14 = sand.u32 1, %s1451_s20   ;;  %s2088_s27 = smov (%p37_p3, %s2086_s27), 0 }
  0x44   : > { %s1014_s11 = sshll.u32 %s229_s14, 5  ;;  %s39_s13 = ssub.s32 %s1467_s24, %s2088_s27 }
  0x45   : > { %p40_p5 = scmp.eq.s32.totalorder %s39_s13, 0  ;;  %s239_s29 = scalar_lea.hbm %s2044_s0, %s1070_s9 }
  0x46   : > { %s233_s15 = scalar_lea.vmem [#allocation2], %s1014_s11  ;;  %p1651_p2 = pnand %p1149_p10, %p51_p0 }
  0x47   : > { %s240_s12 = sshll.u32 %s233_s15, 4  ;;  %s230_s3 = scalar_lea.sflag [#allocation3], %s229_s14  ;;  %s241_s12 = int_to_ptr.vmem [resolvable:$true] %s240_s12 }
  0x48   : > { %s1647_s1 = scalar_select %p40_p5, %s1451_s20, %s42_s8  }
  0x49   : > { %p1341_p7 = pneg %p1651_p2  ;;  %s1352_s13 = scalar_lea.vmem %s241_s12, 512 }
  0x4a   : > { %p1353_p6 = scmp.ne.s32.totalorder %s241_s12, %s1352_s13  ;;  %s1480_s16 = smov [#allocation2]  }
  0x4b   : > { %s1357_s9 = sshll.u32 %s1480_s16, 4  ;;  %s1358_s9 = int_to_ptr.vmem [resolvable:$false] %s1357_s9 }
  0x4c   : > { %p1355_p9 = pnand %p1353_p6, %p1341_p7  ;;  %s1359_s15 = scalar_lea.vmem %s1358_s9, 1024 }
  0x4d   : > { %p1360_p1 = scmp.lt.s32.totalorder %s241_s12, %s1358_s9  ;;  %p1361_p4 = scmp.lt.s32.totalorder %s1359_s15, %s1352_s13 }
  0x4e   : > { %p1356_p12 = pneg %p1355_p9 }
  0x4f   : > { %p1362_p8 = por %p1361_p4, %p1360_p1 }
  0x51   : > { %p1363_p11 = pnand %p1362_p8, %p1356_p12 }
  0x53   : > { %1366 = shalt.err (!%p1363_p11)
}
  0x54   : > { %s2070_s8 = smov 4   ;;  %s2071_s11 = smov 64  }
  0x55   : > { %1141 = dma.hbm_to_vmem [thread:$0]  (!%p1651_p2), %s239_s29, 512, %s241_s12, %s230_s3, %s2071_s11, %s2071_s11, %s2070_s8  }
  0x56   : > { %p2072_p3 = scmp.ne.s32.totalorder %s2063_s7, 0 }
  0x57   : > { %s1665_s14 = sand.u32 (!%p2072_p3), 1, %s1447_s19   ;;  %p2073_p10 = scmp.ne.s32.totalorder (!%p2072_p3), %s2061_s30, 0 }
  0x58   : > { %252 = sbr.rel (%p2072_p3) target bundleno = 650 (0x28a), region = 40  ;;  %s1018_s17 = sshll.u32 (!%p2072_p3), %s1665_s14, 5 }
  0x59   : > { %s255_s13 = scalar_lea.sflag (!%p2072_p3), [#allocation3], %s1665_s14  ;;  %s1669_s16 = scalar_lea.vmem (!%p2072_p3), [#allocation2], %s1018_s17 }
  0x5d   : > { %1426 = dma.done.wait (%p2073_p10), %s255_s13, 512  }
  0x5e   : > { %1428 = vsyncadd (%p2073_p10), %s255_s13, 4294966784  ;;  %p2074_p0 = scmp.ne.s32.totalorder %s2059_s28, 0 }
  0x60   : > { %1430 = dma.done.wait (%p2074_p0), [#allocation6], 4160  }
  0x61   : > { %1432 = vsyncadd (%p2074_p0), [#allocation6], 4294963136 }
  0x62   : > { %1434 = dma.done.wait (%p2074_p0), [#allocation9], 4096  }
  0x63   : > { %1436 = vsyncadd (%p2074_p0), [#allocation9], 4294963200  ;;  %s1022_s2 = sshll.u32 %s1665_s14, 6  ;;  %s1023_s3 = sshll.u32 %s1455_s21, 8  ;;  %v359_v49 = vld [vmem:[%s1669_s16] sm:$0xf] }
  0x64   : > { %s301_s7 = sshra.s32 %s1023_s3, 7  ;;  %s323_s30 = sshra.s32 %s1023_s3, 3  ;;  %v360_v50 = vld [vmem:[%s1669_s16 + $0x4] sm:$0xf]  ;;  %v361_v51 = vld [vmem:[%s1669_s16 + $0x8] sm:$0xf] }
  0x65   : > { %s1024_s12 = sshll.u32 %s301_s7, 2  ;;  %s1025_s29 = sshll.u32 %s323_s30, 2  ;;  %v362_v52 = vld [vmem:[%s1669_s16 + $0xc] sm:$0xf]  ;;  %v363_v53 = vld [vmem:[%s1669_s16 + $0x10] sm:$0xf] }
  0x66   : > { %s304_s9 = scalar_lea.vmem [#allocation5], %s1024_s12  ;;  %s321_s28 = scalar_lea.vmem [#allocation7], %s301_s7  ;;  %v364_v54 = vld [vmem:[%s1669_s16 + $0x14] sm:$0xf]  ;;  %v365_v55 = vld [vmem:[%s1669_s16 + $0x18] sm:$0xf] }
  0x67   : > { %v1685_v0 = vld [vmem:[%s304_s9] sm:$0xff]  ;;  %v1687_v1 = vld [vmem:[%s304_s9 + $0x10] sm:$0xff]  ;;  %s1715_s15 = scalar_lea.vmem [#allocation8], %s1025_s29  ;;  %v366_v56 = vld [vmem:[%s1669_s16 + $0x1c] sm:$0xf]  ;;  %s1823_s8 = scalar_lea.vmem [#allocation10], %s1022_s2 }
  0x68   : > { %v1689_v2 = vld [vmem:[%s304_s9 + $0x20] sm:$0xff]  ;;  %v1691_v3 = vld [vmem:[%s304_s9 + $0x30] sm:$0xff]  ;;  %v1724_v19 = vld [vmem:[%s1715_s15 + $0x8] sm:$0xf]  ;;  %p1026_p5 = scmp.ne.s32.totalorder %s1455_s21, 0 }
  0x69   : > { %v1693_v4 = vld [vmem:[%s304_s9 + $0x40] sm:$0xff]  ;;  %v1695_v5 = vld [vmem:[%s304_s9 + $0x50] sm:$0xff]  ;;  %v1727_v20 = vld [vmem:[%s1715_s15 + $0xc] sm:$0xf] }
  0x6a   : > { %v1697_v6 = vld [vmem:[%s304_s9 + $0x60] sm:$0xff]  ;;  %v1699_v7 = vld [vmem:[%s304_s9 + $0x70] sm:$0xff]  ;;  %v1736_v23 = vld [vmem:[%s1715_s15 + $0x18] sm:$0xf] }
  0x6b   : > { %v1701_v8 = vld [vmem:[%s304_s9 + $0x80] sm:$0xff]  ;;  %v1703_v9 = vld [vmem:[%s304_s9 + $0x90] sm:$0xff]  ;;  %v1739_v24 = vld [vmem:[%s1715_s15 + $0x1c] sm:$0xf] }
  0x6c   : > { %v1705_v10 = vld [vmem:[%s304_s9 + $0xa0] sm:$0xff]  ;;  %v1707_v11 = vld [vmem:[%s304_s9 + $0xb0] sm:$0xff]  ;;  %v1748_v27 = vld [vmem:[%s1715_s15 + $0x28] sm:$0xf] }
  0x6d   : > { %v1709_v12 = vld [vmem:[%s304_s9 + $0xc0] sm:$0xff]  ;;  %v1711_v13 = vld [vmem:[%s304_s9 + $0xd0] sm:$0xff]  ;;  %v1751_v28 = vld [vmem:[%s1715_s15 + $0x2c] sm:$0xf] }
  0x6e   : > { %v319_v14 = vld [vmem:[%s304_s9 + $0xe0] sm:$0xff]  ;;  %v320_v15 = vld [vmem:[%s304_s9 + $0xf0] sm:$0xff]  ;;  %v1760_v31 = vld [vmem:[%s1715_s15 + $0x38] sm:$0xf] }
  0x6f   : > { %v1713_v16 = vld [vmem:[%s321_s28] sm:$0x3]  ;;  %v1721_v18 = vld [vmem:[%s1715_s15 + $0x4] sm:$0xf]  ;;  %v1730_v21 = vld [vmem:[%s1715_s15 + $0x10] sm:$0xf] }
  0x70   : > { %v1718_v17 = vld [vmem:[%s1715_s15] sm:$0xf]  ;;  %v1733_v22 = vld [vmem:[%s1715_s15 + $0x14] sm:$0xf]  ;;  %v1745_v26 = vld [vmem:[%s1715_s15 + $0x24] sm:$0xf] }
  0x71   : > { %v1742_v25 = vld [vmem:[%s1715_s15 + $0x20] sm:$0xf]  ;;  %v1754_v29 = vld [vmem:[%s1715_s15 + $0x30] sm:$0xf]  ;;  %v1757_v30 = vld [vmem:[%s1715_s15 + $0x34] sm:$0xf] }
  0x72   : > { %v1763_v32 = vld [vmem:[%s1715_s15 + $0x3c] sm:$0xf]  ;;  %v1766_v33 = vld [vmem:[%s1715_s15 + $0x40] sm:$0xf]  ;;  %v1769_v34 = vld [vmem:[%s1715_s15 + $0x44] sm:$0xf] }
  0x73   : > { %v1772_v35 = vld [vmem:[%s1715_s15 + $0x48] sm:$0xf]  ;;  %v1775_v36 = vld [vmem:[%s1715_s15 + $0x4c] sm:$0xf]  ;;  %v1778_v37 = vld [vmem:[%s1715_s15 + $0x50] sm:$0xf] }
  0x74   : > { %v1781_v38 = vld [vmem:[%s1715_s15 + $0x54] sm:$0xf]  ;;  %v1784_v39 = vld [vmem:[%s1715_s15 + $0x58] sm:$0xf]  ;;  %v1787_v40 = vld [vmem:[%s1715_s15 + $0x5c] sm:$0xf] }
  0x75   : > { %v1790_v41 = vld [vmem:[%s1715_s15 + $0x60] sm:$0xf]  ;;  %v1793_v42 = vld [vmem:[%s1715_s15 + $0x64] sm:$0xf]  ;;  %v1796_v43 = vld [vmem:[%s1715_s15 + $0x68] sm:$0xf] }
  0x76   : > { %v1799_v44 = vld [vmem:[%s1715_s15 + $0x6c] sm:$0xf]  ;;  %v1802_v45 = vld [vmem:[%s1715_s15 + $0x70] sm:$0xf]  ;;  %v1805_v46 = vld [vmem:[%s1715_s15 + $0x74] sm:$0xf] }
  0x77   : > { %v1808_v47 = vld [vmem:[%s1715_s15 + $0x78] sm:$0xf]  ;;  %v1811_v48 = vld [vmem:[%s1715_s15 + $0x7c] sm:$0xf]  ;;  %370 = sbr.rel (%p1026_p5) target bundleno = 129 (0x81), region = 60 }
  0x7c   : > { %v1481_v57 = vmov 0.0  }
  0x7d   : > { %371 = vst [vmem:[%s1823_s8] sm:$0xff] %v1481_v57  ;;  %372 = vst [vmem:[%s1823_s8 + $0x8] sm:$0xff] %v1481_v57 }
  0x7e   : > { %373 = vst [vmem:[%s1823_s8 + $0x10] sm:$0xff] %v1481_v57  ;;  %374 = vst [vmem:[%s1823_s8 + $0x18] sm:$0xff] %v1481_v57 }
  0x7f   : > { %375 = vst [vmem:[%s1823_s8 + $0x20] sm:$0xff] %v1481_v57  ;;  %376 = vst [vmem:[%s1823_s8 + $0x28] sm:$0xff] %v1481_v57 }
  0x80   : > { %377 = vst [vmem:[%s1823_s8 + $0x30] sm:$0xff] %v1481_v57  ;;  %378 = vst [vmem:[%s1823_s8 + $0x38] sm:$0xff] %v1481_v57 }
  0x81 PF: > { %v1046_v58 = vcombine.high %v319_v14, %v320_v15  ;;  %v1045_v59 = vcombine.low %v319_v14, %v320_v15  ;;  %v1044_v60 = vcombine.high %v1709_v12, %v1711_v13  ;;  %v1043_v61 = vcombine.low %v1709_v12, %v1711_v13  ;;  %p1063_p2 = scmp.ne.s32.totalorder %s1455_s21, 1 }
  0x82   : > { %v1042_v62 = vcombine.high %v1705_v10, %v1707_v11  ;;  %v1482_v63 = vmov 0   ;;  %v1041_v57 = vcombine.low %v1705_v10, %v1707_v11  ;;  %v1040_v14 = vcombine.high %v1701_v8, %v1703_v9 }
  0x83   : > { %494 = vmatprep.subr.bf16.mxu0 %v1046_v58  ;;  %526 = vmatprep.mubr.bf16.mxu0 %v1482_v63  ;;  %v1039_v15 = vcombine.low %v1701_v8, %v1703_v9  ;;  %v1038_v12 = vcombine.high %v1697_v6, %v1699_v7  ;;  %v1037_v13 = vcombine.low %v1697_v6, %v1699_v7 }
  0x84   : > { %495 = vmatpush1.bf16.msra.mxu0 %v1045_v59  ;;  %v1036_v10 = vcombine.high %v1693_v4, %v1695_v5  ;;  %v1035_v11 = vcombine.low %v1693_v4, %v1695_v5  ;;  %v1034_v8 = vcombine.high %v1689_v2, %v1691_v3  ;;  %v1033_v9 = vcombine.low %v1689_v2, %v1691_v3 }
  0x85   : > { %496 = vmatprep.subr.bf16.mxu0 %v1044_v60  ;;  %v1032_v6 = vcombine.high %v1685_v0, %v1687_v1  ;;  %v1031_v7 = vcombine.low %v1685_v0, %v1687_v1  ;;  %v1027_v58 = vcombine.low %v359_v49, %v360_v50  ;;  %v1028_v4 = vcombine.low %v361_v51, %v362_v52 }
  0x86   : > { %v1029_v5 = vcombine.low %v363_v53, %v364_v54  ;;  %v1030_v2 = vcombine.low %v365_v55, %v366_v56  ;;  %v1062_v3 = vcombine.low %v1808_v47, %v1811_v48  ;;  %v1054_v59 = vcombine.low %v1760_v31, %v1763_v32 }
  0x87   : > { %v1061_v0 = vcombine.low %v1802_v45, %v1805_v46  ;;  %v1053_v1 = vcombine.low %v1754_v29, %v1757_v30  ;;  %v1060_v49 = vcombine.low %v1796_v43, %v1799_v44  ;;  %v1052_v50 = vcombine.low %v1748_v27, %v1751_v28 }
  0x88   : > { %497 = vmatpush1.bf16.msra.mxu0 %v1043_v61  ;;  %1072 = vmatprep.subr.bf16.mxu1 %v1062_v3  ;;  %v1059_v31 = vcombine.low %v1790_v41, %v1793_v42  ;;  %v1051_v32 = vcombine.low %v1742_v25, %v1745_v26  ;;  %v1058_v29 = vcombine.low %v1784_v39, %v1787_v40 }
  0x89   : > { %498 = vmatprep.subr.bf16.mxu0 %v1042_v62  ;;  %1073 = vmatpush3.bf16.msra.mxu1 %v1054_v59  ;;  %v1050_v30 = vcombine.low %v1736_v23, %v1739_v24  ;;  %v1057_v27 = vcombine.low %v1778_v37, %v1781_v38  ;;  %v1049_v28 = vcombine.low %v1730_v21, %v1733_v22  ;;  %v380_v37 = vlaneseq }
  0x8a   : > { %1074 = vmatprep.subr.bf16.mxu1 %v1061_v0  ;;  %v1056_v25 = vcombine.low %v1772_v35, %v1775_v36  ;;  %v1048_v26 = vcombine.low %v1724_v19, %v1727_v20  ;;  %v1055_v23 = vcombine.low %v1766_v33, %v1769_v34  ;;  %v1047_v24 = vcombine.low %v1718_v17, %v1721_v18 }
  0x8b   : > { %v381_v21 = vshrl.u32 %v380_v37, 7 }
  0x8c   : > { %499 = vmatpush1.bf16.msra.mxu0 %v1041_v57 }
  0x8d   : > { %500 = vmatprep.subr.bf16.mxu0 %v1040_v14  ;;  %1075 = vmatpush3.bf16.msra.mxu1 %v1053_v1  ;;  %v382_v22 = vsub.s32 0, %v381_v21  ;;  %v386_v38 = vsub.s32 1, %v381_v21 }
  0x8e   : > { %1076 = vmatprep.subr.bf16.mxu1 %v1060_v49 }
  0x8f   : > { %v1895_v39 = vrot.slane %v1713_v16, %v382_v22  ;;  %v1898_v35 = vrot.slane %v1713_v16, %v386_v38 }
  0x90   : > { %501 = vmatpush1.bf16.msra.mxu0 %v1039_v15 }
  0x91   : > { %502 = vmatprep.subr.bf16.mxu0 %v1038_v12  ;;  %1077 = vmatpush3.bf16.msra.mxu1 %v1052_v50 }
  0x92   : > { %1078 = vmatprep.subr.bf16.mxu1 %v1059_v31 }
  0x94   : > { %503 = vmatpush1.bf16.msra.mxu0 %v1037_v13 }
  0x95   : > { %504 = vmatprep.subr.bf16.mxu0 %v1036_v10  ;;  %1079 = vmatpush3.bf16.msra.mxu1 %v1051_v32 }
  0x96   : > { %1080 = vmatprep.subr.bf16.mxu1 %v1058_v29 }
  0x98   : > { %505 = vmatpush1.bf16.msra.mxu0 %v1035_v11 }
  0x99   : > { %506 = vmatprep.subr.bf16.mxu0 %v1034_v8  ;;  %1081 = vmatpush3.bf16.msra.mxu1 %v1050_v30 }
  0x9a   : > { %1082 = vmatprep.subr.bf16.mxu1 %v1057_v27 }
  0x9c   : > { %507 = vmatpush1.bf16.msra.mxu0 %v1033_v9 }
  0x9d   : > { %508 = vmatprep.subr.bf16.mxu0 %v1032_v6  ;;  %1083 = vmatpush3.bf16.msra.mxu1 %v1049_v28 }
  0x9e   : > { %1084 = vmatprep.subr.bf16.mxu1 %v1056_v25 }
  0xa0   : > { %509 = vmatpush1.bf16.msra.mxu0 %v1031_v7 }
  0xa1   : > { %1085 = vmatpush3.bf16.msra.mxu1 %v1048_v26 }
  0xa2   : > { %1086 = vmatprep.subr.bf16.mxu1 %v1055_v23 }
  0xa3   : > { %527 = vmatmul.mubr.bf16.vlgmr.msra.gmra.mxu0 %v1027_v58 }
  0xa4   : > { %536 = vmatprep.mubr.bf16.mxu0 %v1482_v63 }
  0xa5   : > { %1087 = vmatpush3.bf16.msra.mxu1 %v1047_v24 }
  0xab   : > { %537 = vmatmul.mubr.bf16.gmra.mxu0 %v1028_v4 }
  0xac   : > { %546 = vmatprep.mubr.bf16.mxu0 %v1482_v63 }
  0xb3   : > { %547 = vmatmul.mubr.bf16.gmra.mxu0 %v1029_v5 }
  0xb4   : > { %556 = vmatprep.mubr.bf16.mxu0 %v1482_v63 }
  0xbb   : > { %557 = vmatmul.mubr.bf16.gmra.mxu0 %v1030_v2 }
 0x163   : > { %v528_v19 = vpop.f32.mrf.mxu0 }
 0x164   : > { %v529_v20 = vadd.f32 %v528_v19, %v1895_v39 }
 0x165   : > { %v530_v36 = vpop.f32.mrf.mxu0 }
 0x166   : > { %v583_v33 = vmul.f32 0.70710677, %v529_v20  ;;  %v531_v34 = vadd.f32 %v530_v36, %v1898_v35  ;;  %v567_v0 = vmul.f32 0.5, %v529_v20 }
 0x167   : > { %v532_v17 = vpop.f32.mrf.mxu0 }
 0x168   : > { %v584_v18 = vmul.f32 0.70710677, %v531_v34  ;;  %v533_v40 = vadd.f32 %v532_v17, %v1895_v39  ;;  %1229 = verf.f32 %v583_v33  ;;  %v568_v1 = vmul.f32 0.5, %v531_v34 }
 0x169   : > { %v534_v41 = vpop.f32.mrf.mxu0 }
 0x16a   : > { %v585_v42 = vmul.f32 0.70710677, %v533_v40  ;;  %v535_v43 = vadd.f32 %v534_v41, %v1898_v35  ;;  %1231 = verf.f32 %v584_v18  ;;  %v569_v2 = vmul.f32 0.5, %v533_v40 }
 0x16b   : > { %v538_v44 = vpop.f32.mrf.mxu0 }
 0x16c   : > { %1233 = verf.f32 %v585_v42  ;;  %v586_v16 = vmul.f32 0.70710677, %v535_v43  ;;  %v1905_v45 = vadd.f32 %v538_v44, %v1895_v39  ;;  %v570_v31 = vmul.f32 0.5, %v535_v43 }
 0x16d   : > { %v540_v46 = vpop.f32.mrf.mxu0 }
 0x16e   : > { %1235 = verf.f32 %v586_v16  ;;  %v1908_v47 = vadd.f32 %v540_v46, %v1898_v35  ;;  %v587_v48 = vmul.f32 0.70710677, %v1905_v45 }
 0x16f   : > { %v542_v51 = vpop.f32.mrf.mxu0 }
 0x170   : > { %v588_v52 = vmul.f32 0.70710677, %v1908_v47  ;;  %v543_v53 = vadd.f32 %v542_v51, %v1895_v39  ;;  %v572_v41 = vmul.f32 0.5, %v1908_v47 }
 0x171   : > { %v544_v54 = vpop.f32.mrf.mxu0 }
 0x172   : > { %1237 = verf.f32 %v588_v52  ;;  %v589_v55 = vmul.f32 0.70710677, %v543_v53  ;;  %v545_v56 = vadd.f32 %v544_v54, %v1898_v35  ;;  %v573_v42 = vmul.f32 0.5, %v543_v53 }
 0x173   : > { %1239 = verf.f32 %v587_v48  ;;  %v548_v60 = vpop.f32.mrf.mxu0 }
 0x174   : > { %1241 = verf.f32 %v589_v55  ;;  %v590_v61 = vmul.f32 0.70710677, %v545_v56  ;;  %v1915_v62 = vadd.f32 %v548_v60, %v1895_v39  ;;  %v574_v43 = vmul.f32 0.5, %v545_v56 }
 0x175   : > { %v550_v63 = vpop.f32.mrf.mxu0  ;;  %v1230_v14 = vpop.eup %1229 }
 0x176   : > { %1243 = verf.f32 %v590_v61  ;;  %v591_v57 = vmul.f32 0.70710677, %v1915_v62  ;;  %v1919_v15 = vadd.f32 %v550_v63, %v1898_v35  ;;  %v615_v5 = vadd.f32 1.0, %v1230_v14 }
 0x177   : > { %v552_v12 = vpop.f32.mrf.mxu0  ;;  %v1232_v13 = vpop.eup %1231 }
 0x178   : > { %v1922_v10 = vadd.f32 %v552_v12, %v1895_v39  ;;  %v592_v8 = vmul.f32 0.70710677, %v1919_v15  ;;  %1245 = verf.f32 %v591_v57  ;;  %v616_v59 = vadd.f32 1.0, %v1232_v13 }
 0x179   : > { %v1234_v11 = vpop.eup %1233  ;;  %v554_v9 = vpop.f32.mrf.mxu0  ;;  %v631_v25 = vmul.f32 %v615_v5, %v567_v0  ;;  %v576_v14 = vmul.f32 0.5, %v1919_v15 }
 0x17a   : > { %v617_v6 = vadd.f32 1.0, %v1234_v11  ;;  %v593_v7 = vmul.f32 0.70710677, %v1922_v10  ;;  %v1927_v58 = vadd.f32 %v554_v9, %v1898_v35  ;;  %1247 = verf.f32 %v592_v8 }
 0x17b   : > { %v1236_v4 = vpop.eup %1235  ;;  %v558_v3 = vpop.f32.mrf.mxu0  ;;  %v632_v23 = vmul.f32 %v616_v59, %v568_v1  ;;  %v575_v8 = vmul.f32 0.5, %v1915_v62 }
 0x17c   : > { %1249 = verf.f32 %v593_v7  ;;  %v594_v49 = vmul.f32 0.70710677, %v1927_v58  ;;  %v633_v50 = vmul.f32 %v617_v6, %v569_v2  ;;  %v1931_v32 = vadd.f32 %v558_v3, %v1895_v39 }
 0x17d   : > { %v560_v29 = vpop.f32.mrf.mxu0  ;;  %v618_v30 = vadd.f32 1.0, %v1236_v4  ;;  %v578_v13 = vmul.f32 0.5, %v1927_v58 }
 0x17e   : > { %1251 = verf.f32 %v594_v49  ;;  %v1934_v27 = vadd.f32 %v560_v29, %v1898_v35  ;;  %v595_v21 = vmul.f32 0.70710677, %v1931_v32  ;;  %v655_v33 = vpack.c.bf16 %v633_v50, %v631_v25 }
 0x17f   : > { %v1238_v28 = vpop.eup %1237  ;;  %v562_v26 = vpop.f32.mrf.mxu0  ;;  %v634_v24 = vmul.f32 %v618_v30, %v570_v31  ;;  %v579_v29 = vmul.f32 0.5, %v1931_v32  ;;  %v648_v32 = vld [vmem:[%s1823_s8 + $0x8] sm:$0xff] }
 0x180   : > { %v1240_v37 = vpop.eup %1239  ;;  %v596_v22 = vmul.f32 0.70710677, %v1934_v27  ;;  %v563_v19 = vadd.f32 %v562_v26, %v1895_v39  ;;  %v620_v34 = vadd.f32 1.0, %v1238_v28  ;;  %v571_v39 = vmul.f32 0.5, %v1905_v45 }
 0x181   : > { %v1242_v38 = vpop.eup %1241  ;;  %v564_v20 = vpop.f32.mrf.mxu0  ;;  %v656_v36 = vpack.c.bf16 %v634_v24, %v632_v23  ;;  %v619_v16 = vadd.f32 1.0, %v1240_v37  ;;  %v577_v45 = vmul.f32 0.5, %v1922_v10  ;;  %v580_v10 = vmul.f32 0.5, %v1934_v27  ;;  %v647_v37 = vld [vmem:[%s1823_s8] sm:$0xff] }
 0x182   : > { %v621_v17 = vadd.f32 1.0, %v1242_v38  ;;  %1253 = verf.f32 %v596_v22  ;;  %v565_v18 = vadd.f32 %v564_v20, %v1898_v35  ;;  %v597_v44 = vmul.f32 0.70710677, %v563_v19 }
 0x183   : > { %v1244_v40 = vpop.eup %1243  ;;  %791 = vmatprep.mubr.bf16.mxu1 %v656_v36  ;;  %1255 = verf.f32 %v595_v21  ;;  %v636_v51 = vmul.f32 %v620_v34, %v572_v41  ;;  %v635_v60 = vmul.f32 %v619_v16, %v571_v39  ;;  %v581_v50 = vmul.f32 0.5, %v563_v19  ;;  %v651_v39 = vld [vmem:[%s1823_s8 + $0x20] sm:$0xff] }
 0x184   : > { %v622_v46 = vadd.f32 1.0, %v1244_v40  ;;  %v598_v48 = vmul.f32 0.70710677, %v565_v18  ;;  %792 = vmatmul.mubr.bf16.vlgmr.msra.gmra.mxu1 %v655_v33  ;;  %1257 = verf.f32 %v597_v44  ;;  %v637_v52 = vmul.f32 %v621_v17, %v573_v42  ;;  %v649_v17 = vld [vmem:[%s1823_s8 + $0x10] sm:$0xff] }
 0x185   : > { %v1246_v35 = vpop.eup %1245  ;;  %v582_v31 = vmul.f32 0.5, %v565_v18 }
 0x186   : > { %v638_v54 = vmul.f32 %v622_v46, %v574_v43  ;;  %1259 = verf.f32 %v598_v48  ;;  %v657_v63 = vpack.c.bf16 %v637_v52, %v635_v60  ;;  %v623_v12 = vadd.f32 1.0, %v1246_v35  ;;  %v650_v43 = vld [vmem:[%s1823_s8 + $0x18] sm:$0xff] }
 0x187   : > { %v1248_v55 = vpop.eup %1247 }
 0x188   : > { %v658_v47 = vpack.c.bf16 %v638_v54, %v636_v51  ;;  %v624_v56 = vadd.f32 1.0, %v1248_v55  ;;  %v639_v5 = vmul.f32 %v623_v12, %v575_v8  ;;  %v652_v55 = vld [vmem:[%s1823_s8 + $0x28] sm:$0xff] }
 0x189   : > { %v1250_v53 = vpop.eup %1249 }
 0x18a   : > { %v625_v61 = vadd.f32 1.0, %v1250_v53  ;;  %799 = vmatprep.mubr.bf16.mxu1 %v658_v47  ;;  %v640_v9 = vmul.f32 %v624_v56, %v576_v14 }
 0x18b   : > { %v1252_v57 = vpop.eup %1251 }
 0x18c   : > { %v626_v11 = vadd.f32 1.0, %v1252_v57  ;;  %800 = vmatmul.mubr.bf16.gmra.mxu1 %v657_v63  ;;  %v641_v6 = vmul.f32 %v625_v61, %v577_v45  ;;  %v653_v61 = vld [vmem:[%s1823_s8 + $0x30] sm:$0xff]  ;;  %v654_v45 = vld [vmem:[%s1823_s8 + $0x38] sm:$0xff] }
 0x18e   : > { %v642_v7 = vmul.f32 %v626_v11, %v578_v13  ;;  %v659_v15 = vpack.c.bf16 %v641_v6, %v639_v5 }
 0x18f   : > { %v1254_v4 = vpop.eup %1253 }
 0x190   : > { %v660_v2 = vpack.c.bf16 %v642_v7, %v640_v9  ;;  %v1256_v3 = vpop.eup %1255  ;;  %v628_v0 = vadd.f32 1.0, %v1254_v4 }
 0x191   : > { %v1258_v59 = vpop.eup %1257  ;;  %v627_v58 = vadd.f32 1.0, %v1256_v3 }
 0x192   : > { %807 = vmatprep.mubr.bf16.mxu1 %v660_v2  ;;  %v629_v49 = vadd.f32 1.0, %v1258_v59  ;;  %v644_v30 = vmul.f32 %v628_v0, %v580_v10 }
 0x193   : > { %v1260_v1 = vpop.eup %1259  ;;  %v643_v26 = vmul.f32 %v627_v58, %v579_v29 }
 0x194   : > { %v630_v62 = vadd.f32 1.0, %v1260_v1  ;;  %808 = vmatmul.mubr.bf16.gmra.mxu1 %v659_v15  ;;  %v645_v28 = vmul.f32 %v629_v49, %v581_v50 }
 0x196   : > { %v646_v25 = vmul.f32 %v630_v62, %v582_v31  ;;  %v661_v24 = vpack.c.bf16 %v645_v28, %v643_v26 }
 0x198   : > { %v662_v23 = vpack.c.bf16 %v646_v25, %v644_v30 }
 0x19a   : > { %815 = vmatprep.mubr.bf16.mxu1 %v662_v23 }
 0x19c   : > { %816 = vmatmul.mubr.bf16.gmra.mxu1 %v661_v24 }
 0x244   : > { %v1088_v27 = vpop.f32.mrf.mxu1 }
 0x246   : > { %v1089_v21 = vpop.f32.mrf.mxu1 }
 0x247   : > { %v1090_v22 = vadd.f32 %v1089_v21, %v1088_v27 }
 0x248   : > { %v1091_v38 = vpop.f32.mrf.mxu1 }
 0x249   : > { %v824_v19 = vadd.f32 %v1090_v22, %v647_v37 }
 0x24a   : > { %v1092_v20 = vpop.f32.mrf.mxu1 }
 0x24b   : > { %832 = vst [vmem:[%s1823_s8] sm:$0xff] %v824_v19  ;;  %v1093_v36 = vadd.f32 %v1092_v20, %v1091_v38 }
 0x24c   : > { %v1094_v33 = vpop.f32.mrf.mxu1 }
 0x24d   : > { %v825_v34 = vadd.f32 %v1093_v36, %v648_v32 }
 0x24e   : > { %v1095_v18 = vpop.f32.mrf.mxu1 }
 0x24f   : > { %833 = vst [vmem:[%s1823_s8 + $0x8] sm:$0xff] %v825_v34  ;;  %v1096_v40 = vadd.f32 %v1095_v18, %v1094_v33 }
 0x250   : > { %v1097_v41 = vpop.f32.mrf.mxu1 }
 0x251   : > { %v826_v42 = vadd.f32 %v1096_v40, %v649_v17 }
 0x252   : > { %v1098_v44 = vpop.f32.mrf.mxu1 }
 0x253   : > { %834 = vst [vmem:[%s1823_s8 + $0x10] sm:$0xff] %v826_v42  ;;  %v1099_v16 = vadd.f32 %v1098_v44, %v1097_v41 }
 0x254   : > { %v1100_v46 = vpop.f32.mrf.mxu1 }
 0x255   : > { %v827_v48 = vadd.f32 %v1099_v16, %v650_v43 }
 0x256   : > { %v1101_v51 = vpop.f32.mrf.mxu1 }
 0x257   : > { %835 = vst [vmem:[%s1823_s8 + $0x18] sm:$0xff] %v827_v48  ;;  %v1102_v52 = vadd.f32 %v1101_v51, %v1100_v46 }
 0x258   : > { %v1103_v54 = vpop.f32.mrf.mxu1 }
 0x259   : > { %v828_v35 = vadd.f32 %v1102_v52, %v651_v39 }
 0x25a   : > { %v1104_v60 = vpop.f32.mrf.mxu1 }
 0x25b   : > { %836 = vst [vmem:[%s1823_s8 + $0x20] sm:$0xff] %v828_v35  ;;  %v1105_v47 = vadd.f32 %v1104_v60, %v1103_v54 }
 0x25c   : > { %v1106_v53 = vpop.f32.mrf.mxu1 }
 0x25d   : > { %v829_v56 = vadd.f32 %v1105_v47, %v652_v55 }
 0x25e   : > { %v1107_v63 = vpop.f32.mrf.mxu1 }
 0x25f   : > { %837 = vst [vmem:[%s1823_s8 + $0x28] sm:$0xff] %v829_v56  ;;  %v1108_v57 = vadd.f32 %v1107_v63, %v1106_v53 }
 0x260   : > { %v1109_v14 = vpop.f32.mrf.mxu1 }
 0x261   : > { %v830_v12 = vadd.f32 %v1108_v57, %v653_v61 }
 0x262   : > { %v1110_v13 = vpop.f32.mrf.mxu1 }
 0x263   : > { %838 = vst [vmem:[%s1823_s8 + $0x30] sm:$0xff] %v830_v12  ;;  %v1111_v11 = vadd.f32 %v1110_v13, %v1109_v14  ;;  %843 = sbr.rel (%p1063_p2) target bundleno = 626 (0x272), region = 64 }
 0x265   : > { %v831_v8 = vadd.f32 %v1111_v11, %v654_v45 }
 0x267   : > { %839 = vst [vmem:[%s1823_s8 + $0x38] sm:$0xff] %v831_v8 }
 0x268   : > { %v844_v9 = vld [vmem:[%s1823_s8] sm:$0xff]  ;;  %v1064_v6 = vld [vmem:[%s2048_s4] ss:$0 sm:$0xff]  ;;  %v845_v7 = vld [vmem:[%s1823_s8 + $0x8] sm:$0xff] }
 0x269   : > { %v859_v4 = vadd.f32 %v1064_v6, %v844_v9  ;;  %v860_v5 = vadd.f32 %v1064_v6, %v845_v7  ;;  %v846_v2 = vld [vmem:[%s1823_s8 + $0x10] sm:$0xff]  ;;  %v847_v3 = vld [vmem:[%s1823_s8 + $0x18] sm:$0xff]  ;;  %v848_v59 = vld [vmem:[%s1823_s8 + $0x20] sm:$0xff] }
 0x26a   : > { %v861_v0 = vadd.f32 %v1064_v6, %v846_v2  ;;  %v862_v15 = vadd.f32 %v1064_v6, %v847_v3  ;;  %v863_v1 = vadd.f32 %v1064_v6, %v848_v59  ;;  %v849_v10 = vld [vmem:[%s1823_s8 + $0x28] sm:$0xff]  ;;  %v850_v49 = vld [vmem:[%s1823_s8 + $0x30] sm:$0xff] }
 0x26b   : > { %867 = vst [vmem:[%s1823_s8] sm:$0xff] %v859_v4  ;;  %868 = vst [vmem:[%s1823_s8 + $0x8] sm:$0xff] %v860_v5  ;;  %v864_v50 = vadd.f32 %v1064_v6, %v849_v10  ;;  %v865_v31 = vadd.f32 %v1064_v6, %v850_v49 }
 0x26c   : > { %869 = vst [vmem:[%s1823_s8 + $0x10] sm:$0xff] %v861_v0  ;;  %870 = vst [vmem:[%s1823_s8 + $0x18] sm:$0xff] %v862_v15 }
 0x26d   : > { %871 = vst [vmem:[%s1823_s8 + $0x20] sm:$0xff] %v863_v1  ;;  %872 = vst [vmem:[%s1823_s8 + $0x28] sm:$0xff] %v864_v50 }
 0x26e   : > { %v851_v58 = vld [vmem:[%s1823_s8 + $0x38] sm:$0xff]  ;;  %873 = vst [vmem:[%s1823_s8 + $0x30] sm:$0xff] %v865_v31 }
 0x26f   : > { %v866_v62 = vadd.f32 %v1064_v6, %v851_v58 }
 0x271   : > { %874 = vst [vmem:[%s1823_s8 + $0x38] sm:$0xff] %v866_v62 }
 0x272 PF: > { %s1071_s21 = sshll.u32 %s1459_s22, 10  ;;  %s889_s3 = sshll.u32 %s1823_s8, 4  ;;  %s1991_s3 = int_to_ptr.vmem [resolvable:$true] %s889_s3 }
 0x273   : > { %s1988_s2 = scalar_lea.hbm %s2049_s5, %s1071_s21  ;;  %s876_s7 = scalar_lea.sflag [#allocation4], %s1665_s14 }
 0x274   : > { %s1367_s12 = scalar_lea.vmem %s1991_s3, 1024  ;;  %s1483_s30 = smov [#allocation10]  }
 0x275   : > { %p1368_p7 = scmp.ne.s32.totalorder %s1991_s3, %s1367_s12  ;;  %s1371_s29 = sshll.u32 %s1483_s30, 4  ;;  %s1372_s29 = int_to_ptr.vmem [resolvable:$false] %s1371_s29 }
 0x276   : > { %s1373_s22 = scalar_lea.vmem %s1372_s29, 2048  ;;  %p1374_p12 = scmp.lt.s32.totalorder %s1991_s3, %s1372_s29 }
 0x277   : > { %p1369_p6 = pnand %p1368_p7, %p1632_p13  ;;  %p1375_p1 = scmp.lt.s32.totalorder %s1373_s22, %s1367_s12 }
 0x279   : > { %p1370_p9 = pneg %p1369_p6  ;;  %p1376_p4 = por %p1375_p1, %p1374_p12 }
 0x27b   : > { %p1377_p8 = pnand %p1376_p4, %p1370_p9 }
 0x27d   : > { %1380 = shalt.err (!%p1377_p8)
}
 0x27e   : > { %s1381_s9 = scalar_lea.hbm %s1988_s2, 1024  ;;  %s1385_s8 = scalar_lea.hbm %s2049_s5, 4096 }
 0x27f   : > { %p1382_p11 = scmp.ne.s32.totalorder %s1988_s2, %s1381_s9  ;;  %p1386_p0 = scmp.lt.s32.totalorder %s1988_s2, %s2049_s5 }
 0x280   : > { %p1387_p5 = scmp.lt.s32.totalorder %s1385_s8, %s1381_s9 }
 0x281   : > { %p1383_p3 = pnand %p1382_p11, %p1632_p13 }
 0x282   : > { %p1388_p2 = por %p1387_p5, %p1386_p0 }
 0x283   : > { %p1384_p10 = pneg %p1383_p3 }
 0x285   : > { %p1389_p7 = pnand %p1388_p2, %p1384_p10 }
 0x287   : > { %1392 = shalt.err (!%p1389_p7)
}
 0x288   : > { %s1484_s21 = smov 128   ;;  %s1485_s13 = smov 8  }
 0x289   : > { %1126 = dma.vmem_to_hbm [thread:$0]  (%p1632_p13), %s1991_s3, 1024, %s1988_s2, %s876_s7, %s1484_s21, %s1484_s21, %s1485_s13  }
 0x28a PF: > { %p1153_p6 = scmp.ge.s32.totalorder %s1471_s25, 2  ;;  %s904_s16 = sand.u32 1, %s1443_s18  }
 0x28b   : > { %p2075_p9 = scmp.ne.s32.totalorder %s2062_s6, 0  ;;  %s905_s12 = scalar_lea.sflag [#allocation4], %s904_s16 }
 0x28d   : > { %p1143_p12 = pnand %p1153_p6, %p2075_p9 }
 0x28f   : > { %p1144_p1 = pneg %p1143_p12 }
 0x291   : > { %1438 = dma.done.wait (%p1144_p1), %s905_s12, 1024  }
 0x292   : > { %1440 = vsyncadd (%p1144_p1), %s905_s12, 4294966272  ;;  %s23_s25 = sadd.s32 1, %s1471_s25   ;;  %s2076_s18 = smov %s1447_s19 }
 0x293   : > { %p20_p4 = scmp.ge.s32.totalorder %s23_s25, 10   ;;  %s2077_s19 = smov %s1451_s20 }
 0x294   : > { %s2078_s20 = smov %s1647_s1  ;;  %s2079_s21 = smov %s1463_s23 }
 0x295   : > { %s2080_s22 = smov %s1467_s24  ;;  %s2081_s23 = smov %s2084_s26 }
 0x296   : > { %s2082_s24 = smov %s2088_s27  ;;  %22 = sbr.rel (!%p20_p4) target bundleno = 13 (0xd), region = 108 }
 0x29b   :  { %910 = vsyncpa [#allocation3], 1 }
 0x29c   :  { %912 = vsyncpa [#allocation3 + $0x1], 1 }
 0x29d   :  { %913 = vsyncpa [#allocation6], 1 }
 0x29e   :  { %914 = vsyncpa [#allocation9], 1 }
 0x29f   :  { %915 = vsyncpa [#allocation4], 1 }
 0x2a0   :  { %917 = vsyncpa [#allocation4 + $0x1], 1 }

</bundles_post_ra>
